<compile_context>
chip_gen: v7x
topology: tpu7x:2x2x1
jax: 0.10.0
libtpu: 0.0.40
codegen_flags: <defaults>
</compile_context>

<pallas_src>
import functools

import jax
import jax.numpy as jnp
from jax.experimental import pallas as pl
from jax.experimental.pallas import tpu as pltpu


def _round_up(x, m):
    return (x + m - 1) // m * m


# ----------------------------------------------------------------------------
# nconv: graph diffusion as a lane-dense column-tiled GEMM.
# ----------------------------------------------------------------------------
def _nconv_cols_kernel(a_ref, x_ref, o_ref):
    # a_ref: (V, W)  adjacency, VMEM-resident (constant block index)
    # x_ref: (V, TN) lane-dense column tile of x2d
    # o_ref: (W, TN) lane-dense output tile
    acc = jax.lax.dot_general(
        a_ref[...], x_ref[...],
        dimension_numbers=(((0,), (0,)), ((), ())),   # contract A's V dim (no A.T)
        preferred_element_type=jnp.float32,
    )
    o_ref[...] = acc.astype(o_ref.dtype)


def _nconv_2d(x2d, A, *, tn_max=1024):
    """out2d[w, col] = sum_v A[v, w] * x2d[v, col].  x2d: (V, cols), A: (V, W)."""
    V, cols = x2d.shape
    Va, W = A.shape
    assert Va == V, "A's first dim must match the node dim of x"

    LANE = 128
    tn = min(tn_max, _round_up(cols, LANE))          # >=128-lane output tiles
    cols_p = _round_up(cols, tn)
    x_p = x2d if cols_p == cols else jnp.pad(x2d, ((0, 0), (0, cols_p - cols)))

    out = pl.pallas_call(
        _nconv_cols_kernel,
        out_shape=jax.ShapeDtypeStruct((W, cols_p), x2d.dtype),
        grid_spec=pltpu.PrefetchScalarGridSpec(
            num_scalar_prefetch=0,
            grid=(cols_p // tn,),
            in_specs=[
                pl.BlockSpec((V, W), lambda j: (0, 0)),    # A: same block every step
                pl.BlockSpec((V, tn), lambda j: (0, j)),   # x column tile
            ],
            out_specs=pl.BlockSpec((W, tn), lambda j: (0, j)),
        ),
        compiler_params=pltpu.CompilerParams(
            dimension_semantics=("parallel",),
            vmem_limit_bytes=32 * 1024 * 1024,
        ),
    )(A, x_p)
    return out if cols_p == cols else out[:, :cols]


def nconv(x, A, *, tn_max=1024):
    """x: (N, C, V, L), A: (V, W)  ->  (N, C, W, L)  (== einsum 'ncvl,vw->ncwl')."""
    N, C, V, L = x.shape
    W = A.shape[1]
    x2d = jnp.transpose(x, (2, 0, 1, 3)).reshape(V, N * C * L)
    out2d = _nconv_2d(x2d, A, tn_max=tn_max)
    return jnp.transpose(out2d.reshape(W, N, C, L), (1, 2, 0, 3))


# ----------------------------------------------------------------------------
# 1x1 Conv2d (channel mixing + bias) as a per-batch GEMM kernel.
# ----------------------------------------------------------------------------
def _mlp_1x1_kernel(w_ref, b_ref, h_ref, o_ref):
    # w_ref: (Cout, Cin) resident weight; b_ref: (Cout, 1) resident bias
    # h_ref: (1, Cin, TVL) one batch's spatial slab; o_ref: (1, Cout, TVL)
    acc = jnp.dot(w_ref[...], h_ref[0], preferred_element_type=jnp.float32)
    o_ref[0] = (acc + b_ref[...]).astype(o_ref.dtype)


def mlp_1x1(h, w, b, *, tvl_max=2048):
    """h: (N, Cin, V, L), w: (Cout, Cin), b: (Cout,) -> (N, Cout, V, L)."""
    N, Cin, V, L = h.shape
    Cout = w.shape[0]
    VL = V * L

    LANE = 128
    tvl = min(tvl_max, _round_up(VL, LANE))
    VLp = _round_up(VL, tvl)
    h3 = h.reshape(N, Cin, VL)
    if VLp != VL:
        h3 = jnp.pad(h3, ((0, 0), (0, 0), (0, VLp - VL)))
    b2 = b.reshape(Cout, 1).astype(jnp.float32)

    out3 = pl.pallas_call(
        _mlp_1x1_kernel,
        out_shape=jax.ShapeDtypeStruct((N, Cout, VLp), h.dtype),
        grid_spec=pltpu.PrefetchScalarGridSpec(
            num_scalar_prefetch=0,
            grid=(N, VLp // tvl),
            in_specs=[
                pl.BlockSpec((Cout, Cin), lambda n, j: (0, 0)),
                pl.BlockSpec((Cout, 1), lambda n, j: (0, 0)),
                pl.BlockSpec((1, Cin, tvl), lambda n, j: (n, 0, j)),
            ],
            out_specs=pl.BlockSpec((1, Cout, tvl), lambda n, j: (n, 0, j)),
        ),
        compiler_params=pltpu.CompilerParams(
            dimension_semantics=("parallel", "parallel"),
            vmem_limit_bytes=32 * 1024 * 1024,
        ),
    )(w, b2, h3)
    if VLp != VL:
        out3 = out3[:, :, :VL]
    return out3.reshape(N, Cout, V, L)


# ----------------------------------------------------------------------------
# Full GCN forward.
# ----------------------------------------------------------------------------
def gcn_forward(x, supports, w_mlp, b_mlp, *, order=2, dropout=0.0,
                training=False, rng=None, tn_max=1024):
    """GCN.forward: x (N,C,V,L), supports list of (V,V), w_mlp (Cout, (order*S+1)*C)."""
    N, C, V, L = x.shape
    cols = N * C * L

    # One layout transpose into the lane-dense node-major slab; every diffusion
    # hop (including order >= 2 repeats) stays in this 2-D layout.
    x2d = jnp.transpose(x, (2, 0, 1, 3)).reshape(V, cols)

    slabs = []
    for A in supports:
        s = _nconv_2d(x2d, A, tn_max=tn_max)
        slabs.append(s)
        for _ in range(2, order + 1):
            s = _nconv_2d(s, A, tn_max=tn_max)
            slabs.append(s)

    def to_ncvl(s2d):
        Wn = s2d.shape[0]
        return jnp.transpose(s2d.reshape(Wn, N, C, L), (1, 2, 0, 3))

    # Channel concat in the exact PyTorch order: [x, hop1_a1, hop2_a1, hop1_a2, ...]
    h = jnp.concatenate([x] + [to_ncvl(s) for s in slabs], axis=1)

    out = mlp_1x1(h, w_mlp, b_mlp)

    if training and dropout > 0.0:
        # F.dropout equivalent (inverted dropout); plain-JAX glue in the wrapper.
        if rng is None:
            raise ValueError("rng key required when training with dropout > 0")
        keep = jax.random.bernoulli(rng, 1.0 - dropout, out.shape)
        out = jnp.where(keep, out / (1.0 - dropout), jnp.zeros_like(out))
    return out


# ----------------------------------------------------------------------------
# Pure-JAX reference (mirrors the PyTorch module, eval mode).
# ----------------------------------------------------------------------------
def gcn_reference(x, supports, w_mlp, b_mlp, *, order=2):
    out = [x]
    for A in supports:
        x1 = jnp.einsum("ncvl,vw->ncwl", x, A)
        out.append(x1)
        for _ in range(2, order + 1):
            x2 = jnp.einsum("ncvl,vw->ncwl", x1, A)
            out.append(x2)
            x1 = x2
    h = jnp.concatenate(out, axis=1)
    return jnp.einsum("oc,ncvl->novl", w_mlp, h) + b_mlp[None, :, None, None]


if __name__ == "__main__":
    # Small shapes consistent with graph-wavenet usage:
    #   batch N=2, channels C=4, nodes V=16, seq L=8, support_len=3, order=2,
    #   c_out=32 -> mlp input channels = (order*support_len+1)*C = 28.
    key = jax.random.PRNGKey(0)
    ks = jax.random.split(key, 8)
    N, C, V, L = 2, 4, 16, 8
    support_len, order, c_out = 3, 2, 32
    c_in_total = (order * support_len + 1) * C

    x = jax.random.normal(ks[0], (N, C, V, L), dtype=jnp.float32)
    supports = [
        jax.nn.softmax(jax.random.normal(ks[1 + i], (V, V), dtype=jnp.float32), axis=1)
        for i in range(support_len)
    ]
    w_mlp = (jax.random.normal(ks[4], (c_out, c_in_total), dtype=jnp.float32)
             / jnp.sqrt(c_in_total))
    b_mlp = 0.1 * jax.random.normal(ks[5], (c_out,), dtype=jnp.float32)

    # Check the nconv kernel alone against the einsum semantics.
    x1 = jax.block_until_ready(nconv(x, supports[0]))
    x1_ref = jnp.einsum("ncvl,vw->ncwl", x, supports[0])
    assert x1.shape == (N, C, V, L)
    assert jnp.allclose(x1, x1_ref, atol=1e-4, rtol=1e-4), "nconv mismatch vs reference"

    # Full GCN forward (eval mode: dropout is identity, matching F.dropout(training=False)).
    gcn_jit = jax.jit(
        gcn_forward, static_argnames=("order", "dropout", "training", "tn_max"))
    y = gcn_jit(x, supports, w_mlp, b_mlp, order=order, dropout=0.3, training=False)
    y = jax.block_until_ready(y)

    ref = gcn_reference(x, supports, w_mlp, b_mlp, order=order)
    assert y.shape == (N, c_out, V, L)
    assert jnp.allclose(y, ref, atol=1e-4, rtol=1e-4), "GCN mismatch vs reference"

    print("KERNEL_OK")
</pallas_src>

<mosaic_0001>
module attributes {stable_mosaic.version = 11 : i64} {
  func.func @_nconv_cols_kernel(%arg0: i32, %arg1: memref<16x16xf32, #tpu.memory_space<vmem>>, %arg2: memref<16x128xf32, #tpu.memory_space<vmem>>, %arg3: memref<16x128xf32, #tpu.memory_space<vmem>>) attributes {dimension_semantics = [#tpu.dimension_semantics<parallel>], iteration_bounds = array<i64: 1>, scalar_prefetch = 0 : i64, scratch_operands = 0 : i64, tpu.core_type = #tpu.core_type<tc>, window_params = [{pipeline_mode = #tpu.pipeline_mode<synchronous>, transform_indices = @transform_0, window_bounds = array<i64: 16, 16>}, {transform_indices = @transform_1, window_bounds = array<i64: 16, 128>}, {transform_indices = @transform_2, window_bounds = array<i64: 16, 128>}]} {
    %c0 = arith.constant 0 : index
    %c0_0 = arith.constant 0 : index
    %0 = vector.load %arg1[%c0, %c0_0] : memref<16x16xf32, #tpu.memory_space<vmem>>, vector<16x16xf32>
    %c0_1 = arith.constant 0 : index
    %c0_2 = arith.constant 0 : index
    %1 = vector.load %arg2[%c0_1, %c0_2] : memref<16x128xf32, #tpu.memory_space<vmem>>, vector<16x128xf32>
    %cst = arith.constant dense<0.000000e+00> : vector<16x128xf32>
    %2 = tpu.matmul %0, %1, %cst {dimension_numbers = #tpu.dot_dimension_numbers<[0], [0], [1], [1], [0, 1, 1, 1], [], []>} : vector<16x16xf32>, vector<16x128xf32>, vector<16x128xf32> -> vector<16x128xf32>
    %c0_3 = arith.constant 0 : index
    %c0_4 = arith.constant 0 : index
    %3 = vector.load %arg3[%c0_3, %c0_4] : memref<16x128xf32, #tpu.memory_space<vmem>>, vector<16x128xf32>
    tpu.vector_store %arg3[%c0_3, %c0_4], %2 {strides = array<i32>} : memref<16x128xf32, #tpu.memory_space<vmem>>, vector<16x128xf32>,
    return
  }
  func.func @transform_0(%arg0: i32) -> (i32, i32) {
    %c0_i32 = arith.constant 0 : i32
    %c0_i32_0 = arith.constant 0 : i32
    %c0_i32_1 = arith.constant 0 : i32
    return %c0_i32, %c0_i32_0 : i32, i32
  }
  func.func @transform_1(%arg0: i32) -> (i32, i32) {
    %c0_i32 = arith.constant 0 : i32
    %c0_i32_0 = arith.constant 0 : i32
    return %c0_i32, %arg0 : i32, i32
  }
  func.func @transform_2(%arg0: i32) -> (i32, i32) {
    %c0_i32 = arith.constant 0 : i32
    %c0_i32_0 = arith.constant 0 : i32
    return %c0_i32, %arg0 : i32, i32
  }
}

</mosaic_0001>

<bundles_post_ra>
// kernel: tpu_custom_call.1
= control target key start
LH: loop header
LB: loop body
LE: loop exit
PB: predicated region body
PF: predicated region fallthrough
CT: control target
= control target key end

     0   :  { %7 = vsyncpa [#allocation3], 0  ;;  %s338_s0 = inlined_call_operand.hbm [shape: f32[16,16], index: 0, kind: input, shape index: {}]   ;;  %s339_s1 = inlined_call_operand.hbm [shape: f32[16,128], index: 1, kind: input, shape index: {}]   ;;  %s340_s2 = inlined_call_operand.hbm [shape: f32[16,128], index: 2, kind: output, shape index: {}]  }
   0x1   :  { %8 = vsyncpa [#allocation6], 0 }
   0x2   :  { %9 = vsyncpa [#allocation4], 0  ;;  %s273_s9 = smov [#allocation2]   ;;  %s201_s13 = scalar_lea.hbm %s338_s0, 256 }
   0x3   :  { %s15_s10 = sshll.u32 %s273_s9, 4  ;;  %p202_p0 = scmp.ne.s32.totalorder %s338_s0, %s201_s13  ;;  %s16_s10 = int_to_ptr.vmem [resolvable:$true] %s15_s10 }
   0x4   :  { %p205_p1 = scmp.lt.u32.totalorder %s201_s13, %s338_s0 }
   0x6   :  { %p207_p2 = pnand %p205_p1, %p202_p0 }
   0x8   :  { %210 = shalt.err (!%p207_p2)
}
   0x9   :  { %s211_s18 = scalar_lea.vmem %s16_s10, 256  ;;  %p216_p4 = scmp.lt.s32.totalorder %s16_s10, %s16_s10 }
   0xa   :  { %p212_p3 = scmp.ne.s32.totalorder %s16_s10, %s211_s18  ;;  %p217_p5 = scmp.lt.s32.totalorder %s211_s18, %s211_s18 }
   0xc   :  { %p218_p6 = por %p217_p5, %p216_p4 }
   0xe   :  { %p219_p7 = pnand %p218_p6, %p212_p3 }
  0x10   :  { %222 = shalt.err (!%p219_p7)
}
  0x11   :  { %s274_s19 = smov 128   ;;  %s275_s20 = smov 8  }
  0x12   :  { %21 = dma.hbm_to_vmem [thread:$0]  %s338_s0, 256, %s16_s10, [#allocation3], %s274_s19, %s274_s19, %s275_s20  }
  0x13   :  { %s276_s23 = smov [#allocation5]   ;;  %s223_s27 = scalar_lea.hbm %s339_s1, 256 }
  0x14   :  { %s27_s24 = sshll.u32 %s276_s23, 4  ;;  %p224_p8 = scmp.ne.s32.totalorder %s339_s1, %s223_s27  ;;  %s28_s24 = int_to_ptr.vmem [resolvable:$true] %s27_s24 }
  0x15   :  { %p227_p9 = scmp.lt.u32.totalorder %s223_s27, %s339_s1 }
  0x17   :  { %p229_p10 = pnand %p227_p9, %p224_p8 }
  0x19   :  { %232 = shalt.err (!%p229_p10)
}
  0x1a   :  { %s233_s4 = scalar_lea.vmem %s28_s24, 256  ;;  %p238_p12 = scmp.lt.s32.totalorder %s28_s24, %s28_s24 }
  0x1b   :  { %p234_p11 = scmp.ne.s32.totalorder %s28_s24, %s233_s4  ;;  %p239_p13 = scmp.lt.s32.totalorder %s233_s4, %s233_s4 }
  0x1d   :  { %p240_p0 = por %p239_p13, %p238_p12 }
  0x1f   :  { %p241_p1 = pnand %p240_p0, %p234_p11 }
  0x21   :  { %244 = shalt.err (!%p241_p1)
}
  0x22   :  { %33 = dma.hbm_to_vmem [thread:$0]  %s339_s1, 256, %s28_s24, [#allocation6], %s274_s19, %s274_s19, %s275_s20  }
  0x23   :  { %267 = dma.done.wait [#allocation3], 256  }
  0x24   :  { %268 = vsyncadd [#allocation3], 4294967040 }
  0x25   :  { %269 = dma.done.wait [#allocation6], 256  }
  0x26   :  { %270 = vsyncadd [#allocation6], 4294967040  ;;  %v40_v0 = vld [vmem:[#allocation2] sm:$0xff]  ;;  %v42_v1 = vld [vmem:[#allocation5] sm:$0xff]  ;;  %vm76_vm0 = vcmask 130048   ;;  %s277_s6 = smov [#allocation7]  }
  0x27   :  { %44 = vxpose.xlu0.b32.start [1/2] (short) (narrow) %v40_v0, 16  ;;  %v43_v2 = vld [vmem:[#allocation5 + $0x8] sm:$0xff]  ;;  %v41_v3 = vld [vmem:[#allocation2 + $0x8] sm:$0xff]  ;;  %s165_s1 = sshll.u32 %s277_s6, 4  ;;  %s166_s1 = int_to_ptr.vmem [resolvable:$true] %s165_s1 }
  0x28   :  { %v191_v4 = vpack.c.bf16 %v43_v2, %v42_v1  ;;  %s245_s7 = scalar_lea.vmem %s166_s1, 256  ;;  %p250_p3 = scmp.lt.s32.totalorder %s166_s1, %s166_s1 }
  0x29   :  { %p246_p2 = scmp.ne.s32.totalorder %s166_s1, %s245_s7  ;;  %p251_p4 = scmp.lt.s32.totalorder %s245_s7, %s245_s7 }
  0x2a   :  { %192 = vmatprep.subr.bf16.mxu0 %v191_v4 }
  0x2b   :  { %45 = vxpose.xlu0.b32.end [2/2] (short) (narrow) %v41_v3, 16  ;;  %194 = vmatpush3.bf16.msra.mxu0 %v191_v4  ;;  %p252_p5 = por %p251_p4, %p250_p3 }
  0x2d   :  { %p253_p6 = pnand %p252_p5, %p246_p2 }
  0xa7   :  { %v60_v5 = vpop.trf.xlu0 }
  0xa8   :  { %188 = vmatprep.mubr.msk.f32.mxu0 %vm76_vm0, %v60_v5 }
  0xab   :  { %v61_v6 = vpop.trf.xlu0 }
  0xac   :  { %189 = vmatmul.mubr.msk.f32.vlgmr.msra.gmra.mrb[0].mxu0 %vm76_vm0, %v61_v6 }
 0x17f   :  { %v190_v7 = vpop.f32.mrb[0].mxu0 }
 0x180   :  { %159 = vst [vmem:[#allocation7 + $0x8] sm:$0xff] %v190_v7  ;;  %v149_v8 = vpop.f32.mrb[1].mxu0 }
 0x181   :  { %158 = vst [vmem:[#allocation7] sm:$0xff] %v149_v8 }
 0x182   :  { %256 = shalt.err (!%p253_p6)
}
 0x183   :  { %s257_s10 = scalar_lea.hbm %s340_s2, 256 }
 0x184   :  { %p258_p7 = scmp.ne.s32.totalorder %s340_s2, %s257_s10  ;;  %p261_p8 = scmp.lt.u32.totalorder %s257_s10, %s340_s2 }
 0x186   :  { %p263_p9 = pnand %p261_p8, %p258_p7 }
 0x188   :  { %266 = shalt.err (!%p263_p9)
}
 0x189   :  { %171 = dma.vmem_to_hbm [thread:$0]  %s166_s1, 256, %s340_s2, [#allocation4], %s274_s19, %s274_s19, %s275_s20  }
 0x18a   :  { %271 = dma.done.wait [#allocation4], 256  }
 0x18b   :  { %272 = vsyncadd [#allocation4], 4294967040 }
 0x18c   :  { %175 = vsyncpa [#allocation3], 1 }
 0x18d   :  { %176 = vsyncpa [#allocation6], 1 }
 0x18e   :  { %177 = vsyncpa [#allocation4], 1 }

</bundles_post_ra>
